<compile_context>
chip_gen: v7x
topology: tpu7x:2x2x1
jax: 0.10.0
libtpu: 0.0.40
codegen_flags: <defaults>
</compile_context>

<pallas_src>
import functools

import jax
import jax.numpy as jnp
from jax.experimental import pallas as pl
from jax.experimental.pallas import tpu as pltpu


def _cdiv(a, b):
    return (a + b - 1) // b


def _round_up(a, m):
    return _cdiv(a, m) * m


# ----------------------------------------------------------------------------
# Kernel
# ----------------------------------------------------------------------------
def _self_attention_kernel(q_ref, x_ref, mask_ref, wv_ref, o_ref,
                           m_sc, l_sc, acc_sc, *, n_total, block_n):
    # q_ref:    (TB, Fi)      folded query  q' = query @ (Wq^T Wk), f32
    # x_ref:    (TB, TN, Fi)  node-feature chunk (input dtype; cast in-kernel)
    # mask_ref: (TB, TN)      attention mask chunk (0 == masked out), f32
    # wv_ref:   (Fi, Fo)      pre-transposed V projection (bf16 by default)
    # o_ref:    (TB, Fo)      f32 output block (lane-dense, written once)
    # m_sc / l_sc / acc_sc:   online-softmax running max / denom / numerator
    nb = pl.program_id(1)
    n_steps = pl.num_programs(1)

    @pl.when(nb == 0)
    def _init():
        m_sc[...] = jnp.full_like(m_sc, -jnp.inf)
        l_sc[...] = jnp.zeros_like(l_sc)
        acc_sc[...] = jnp.zeros_like(acc_sc)

    tb, tn, fi = x_ref.shape
    fo = wv_ref.shape[1]

    x_t = x_ref[...]
    keep = mask_ref[...] != 0.0                               # (TB, TN)

    if n_total % block_n != 0:
        # Ragged last node chunk: neutralize out-of-range columns so garbage
        # reads can never contaminate the softmax or the V accumulation.
        col = jax.lax.broadcasted_iota(jnp.int32, (tb, tn), 1) + nb * block_n
        valid = col < n_total
        keep = jnp.logical_and(keep, valid)
        x_t = jnp.where(valid[:, :, None], x_t, jnp.zeros((), x_t.dtype))

    # scores[b, j] = <q'[b], x[b, j]>  (Q == 1: broadcast-mul + lane reduce,
    # f32 throughout; Wq / Wk were folded into q' in the wrapper).
    q_t = q_ref[...].astype(jnp.float32)
    s_raw = jnp.sum(q_t[:, None, :] * x_t.astype(jnp.float32), axis=2)
    s = jnp.where(keep, s_raw, jnp.float32(-1e9))             # masked_fill

    # V projection for this node chunk: bf16 MXU matmul, f32 accumulation.
    p_v = jnp.dot(x_t.reshape(tb * tn, fi).astype(wv_ref.dtype), wv_ref[...],
                  preferred_element_type=jnp.float32).reshape(tb, tn, fo)

    # Online-softmax update across node chunks.
    m_prev = m_sc[...]
    m_new = jnp.maximum(m_prev, jnp.max(s, axis=1, keepdims=True))
    alpha = jnp.exp(m_prev - m_new)
    p = jnp.exp(s - m_new)                                     # (TB, TN)
    l_sc[...] = alpha * l_sc[...] + jnp.sum(p, axis=1, keepdims=True)
    acc_sc[...] = alpha * acc_sc[...] + jnp.sum(p[:, :, None] * p_v, axis=1)
    m_sc[...] = m_new

    @pl.when(nb == n_steps - 1)
    def _finalize():
        inv = pl.reciprocal(l_sc[...], approx=True)
        o_ref[...] = (acc_sc[...] * inv).astype(o_ref.dtype)


# ----------------------------------------------------------------------------
# Tile sizing (generation-aware, intermediates included)
# ----------------------------------------------------------------------------
def _vmem_need(tb, tn, fi, fo, x_item, w_item):
    x_blk = tb * tn * fi * x_item
    mask_blk = tb * tn * 4
    q_blk = tb * fi * 4
    o_blk = tb * fo * 4
    w_blk = fi * fo * w_item
    scratch = tb * (fo + 2) * 4
    # Conservative estimate of in-kernel temporaries (Mosaic may fuse some of
    # them, but budget as if they materialize):
    interm = tb * tn * (4 * fi      # f32 score broadcast product
                        + 2 * fi    # bf16 copy of the x chunk for the MXU
                        + 4 * fo    # P_v (f32)
                        + 4 * fo    # weighted-sum broadcast product
                        + 4 * 4)    # scores / exp / probs temporaries
    # x / mask / q blocks are double-buffered by the pipeline; the weight and
    # output blocks have constant index maps along the streamed axis.
    return 2 * (x_blk + mask_blk + q_blk) + w_blk + o_blk + scratch + interm


def _tpu_memory_config():
    """(vmem_budget_for_tiling, vmem_limit_bytes, tensorcores_per_chip)."""
    vmem_bytes = None
    try:
        vmem_bytes = int(pltpu.get_tpu_info().vmem_capacity_bytes)
    except Exception:
        vmem_bytes = None
    if vmem_bytes is not None and vmem_bytes >= 120 * 1024 * 1024:
        # v5e / v6e: 128 MiB VMEM, single TensorCore per chip.
        return 96 * 1024 * 1024, 112 * 1024 * 1024, 1
    # v7x-class (64 MiB per TensorCore, 2 TCs) or unknown: stay conservative.
    return 40 * 1024 * 1024, 56 * 1024 * 1024, 2


def _choose_tiles(b, n, fi, fo, x_item, w_item, vmem_budget, num_cores):
    tb_cap = b if b <= 8 else min(256, _round_up(b, 8))

    def fits(tb, tn):
        return _vmem_need(tb, tn, fi, fo, x_item, w_item) <= vmem_budget

    def shrink(tb):
        return max(8, _round_up(tb // 2, 8))

    # First choice: the whole node axis in one chunk (single-pass softmax).
    tb, tn = tb_cap, n
    while tb > 8 and not fits(tb, tn):
        tb = shrink(tb)

    # If that still busts VMEM and N is large, stream the node axis in
    # lane-aligned chunks (the kernel's online softmax handles the rest).
    if not fits(tb, tn) and n > 128:
        tn = min(512, _round_up(n, 128))
        while tn > 128 and not fits(8, tn):
            tn //= 2
        tb = tb_cap
        while tb > 8 and not fits(tb, tn):
            tb = shrink(tb)

    # Megacore: only on 2-TensorCore chips keep >= 2 batch steps so both cores
    # get work; on single-TC chips let the batch tile grow.
    if num_cores >= 2:
        while tb > 8 and _cdiv(b, tb) < 2:
            tb = shrink(tb)
    return tb, tn


# ----------------------------------------------------------------------------
# Wrapper
# ----------------------------------------------------------------------------
def self_attention(query, x, attention_mask, wq, wk, wv, *,
                   block_b=None, block_n=None, use_bf16=True):
    """query: (B, 1, Fi); x: (B, N, Fi); attention_mask: (B, N) (nonzero=keep).
    wq/wk/wv follow the PyTorch nn.Linear convention (shape (Fo, Fi), y = x W^T)."""
    B, Q, Fi = query.shape
    assert Q == 1, "SelfAttentionLayer uses a single query vector per batch"
    _, N, _ = x.shape
    Fo = wq.shape[0]

    gemm_dtype = jnp.bfloat16 if use_bf16 else jnp.float32
    budget, vmem_limit, num_cores = _tpu_memory_config()

    x_item = jnp.dtype(x.dtype).itemsize
    w_item = jnp.dtype(gemm_dtype).itemsize
    tb, tn = _choose_tiles(B, N, Fi, Fo, x_item, w_item, budget, num_cores)
    if block_b is not None:
        tb = block_b
    if block_n is not None:
        tn = block_n

    # ---- tiny wrapper-side prep; x itself is passed through untouched ----
    # Algebraic fold:  P_q @ P_k^T == (q @ (Wq^T Wk)) @ x^T,
    # so only the V projection runs on the MXU inside the kernel.
    wqk = wq.T.astype(jnp.float32) @ wk.astype(jnp.float32)        # (Fi, Fi)
    q_fold = query.reshape(B, Fi).astype(jnp.float32) @ wqk        # (B, Fi)
    mask_f = attention_mask.astype(jnp.float32)                    # (B, N)
    wv_t = wv.T.astype(gemm_dtype)                                 # (Fi, Fo)

    kernel = functools.partial(_self_attention_kernel, n_total=N, block_n=tn)

    grid_spec = pltpu.PrefetchScalarGridSpec(
        num_scalar_prefetch=0,
        grid=(_cdiv(B, tb), _cdiv(N, tn)),
        in_specs=[
            pl.BlockSpec((tb, Fi), lambda b, n: (b, 0)),           # q'
            pl.BlockSpec((tb, tn, Fi), lambda b, n: (b, n, 0)),    # x chunk
            pl.BlockSpec((tb, tn), lambda b, n: (b, n)),           # mask chunk
            pl.BlockSpec((Fi, Fo), lambda b, n: (0, 0)),           # Wv^T
        ],
        out_specs=pl.BlockSpec((tb, Fo), lambda b, n: (b, 0)),
        scratch_shapes=[
            pltpu.VMEM((tb, 1), jnp.float32),   # running max
            pltpu.VMEM((tb, 1), jnp.float32),   # running denom
            pltpu.VMEM((tb, Fo), jnp.float32),  # running numerator
        ],
    )

    out2d = pl.pallas_call(
        kernel,
        out_shape=jax.ShapeDtypeStruct((B, Fo), jnp.float32),
        grid_spec=grid_spec,
        compiler_params=pltpu.CompilerParams(
            dimension_semantics=("parallel", "arbitrary"),
            vmem_limit_bytes=vmem_limit,
        ),
    )(q_fold, x, mask_f, wv_t)

    return out2d.reshape(B, 1, Fo)


# ----------------------------------------------------------------------------
# Pure-JAX reference mirroring the PyTorch module
# ----------------------------------------------------------------------------
def reference(query, x, attention_mask, wq, wk, wv):
    p_q = jnp.einsum("bqf,of->bqo", query, wq)
    p_k = jnp.einsum("bnf,of->bno", x, wk)
    p_v = jnp.einsum("bnf,of->bno", x, wv)
    s = jnp.einsum("bqo,bno->bqn", p_q, p_k)
    m = attention_mask[:, None, :]          # (B, 1, N)
    s = jnp.where(m == 0.0, -1e9, s)
    p = jax.nn.softmax(s, axis=2)
    return jnp.einsum("bqn,bno->bqo", p, p_v)


if __name__ == "__main__":
    # Small shapes consistent with the module: query (B, 1, 2*hidden), x (B, N, 2*hidden)
    B, Q, N = 2, 1, 8
    in_features = 32
    out_features = 32

    key = jax.random.PRNGKey(0)
    k_q, k_x, k_m, k_wq, k_wk, k_wv = jax.random.split(key, 6)

    query = jax.random.normal(k_q, (B, Q, in_features), dtype=jnp.float32)
    x = jax.random.normal(k_x, (B, N, in_features), dtype=jnp.float32)
    # mask: 1.0 = keep, 0.0 = masked out (ensure at least one node kept per batch)
    attention_mask = (jax.random.uniform(k_m, (B, N)) > 0.3).astype(jnp.float32)
    attention_mask = attention_mask.at[:, 0].set(1.0)

    scale = 1.0 / jnp.sqrt(in_features)
    wq = jax.random.uniform(k_wq, (out_features, in_features), jnp.float32, -scale, scale)
    wk = jax.random.uniform(k_wk, (out_features, in_features), jnp.float32, -scale, scale)
    wv = jax.random.uniform(k_wv, (out_features, in_features), jnp.float32, -scale, scale)

    out = self_attention(query, x, attention_mask, wq, wk, wv)
    out = jax.block_until_ready(out)

    ref = reference(query, x, attention_mask, wq, wk, wv)
    assert out.shape == (B, Q, out_features)
    # Tolerance accommodates the bf16 MXU operands (f32 accumulation) and the
    # EUP approx reciprocal in the softmax denominator.
    assert jnp.allclose(out, ref, atol=2e-2, rtol=2e-2), "Pallas output mismatch vs reference"

    print("KERNEL_OK")
</pallas_src>

<mosaic_0001>
module attributes {stable_mosaic.version = 11 : i64} {
  func.func @_self_attention_kernel(%arg0: i32, %arg1: i32, %arg2: memref<2x32xf32, #tpu.memory_space<vmem>>, %arg3: memref<2x8x32xf32, #tpu.memory_space<vmem>>, %arg4: memref<2x8xf32, #tpu.memory_space<vmem>>, %arg5: memref<32x32xbf16, #tpu.memory_space<vmem>>, %arg6: memref<2x32xf32, #tpu.memory_space<vmem>>, %arg7: memref<2x1xf32, #tpu.memory_space<vmem>>, %arg8: memref<2x1xf32, #tpu.memory_space<vmem>>, %arg9: memref<2x32xf32, #tpu.memory_space<vmem>>) attributes {dimension_semantics = [#tpu.dimension_semantics<parallel>, #tpu.dimension_semantics<arbitrary>], iteration_bounds = array<i64: 1, 1>, scalar_prefetch = 0 : i64, scratch_operands = 3 : i64, tpu.core_type = #tpu.core_type<tc>, window_params = [{transform_indices = @transform_0, window_bounds = array<i64: 2, 32>}, {transform_indices = @transform_1, window_bounds = array<i64: 2, 8, 32>}, {transform_indices = @transform_2, window_bounds = array<i64: 2, 8>}, {pipeline_mode = #tpu.pipeline_mode<synchronous>, transform_indices = @transform_3, window_bounds = array<i64: 32, 32>}, {transform_indices = @transform_4, window_bounds = array<i64: 2, 32>}]} {
    %c0_i32 = arith.constant 0 : i32
    %0 = arith.cmpi eq, %arg1, %c0_i32 : i32
    %1 = arith.extui %0 : i1 to i32
    %c0_i32_0 = arith.constant 0 : i32
    %2 = arith.cmpi ne, %1, %c0_i32_0 : i32
    scf.if %2 {
      %cst_29 = arith.constant 0xFF800000 : f32
      %47 = vector.broadcast %cst_29 : f32 to vector<2x1xf32>
      %c0_30 = arith.constant 0 : index
      %c0_31 = arith.constant 0 : index
      %48 = vector.load %arg7[%c0_30, %c0_31] : memref<2x1xf32, #tpu.memory_space<vmem>>, vector<2x1xf32>
      tpu.vector_store %arg7[%c0_30, %c0_31], %47 {strides = array<i32>} : memref<2x1xf32, #tpu.memory_space<vmem>>, vector<2x1xf32>,
      %cst_32 = arith.constant 0.000000e+00 : f32
      %49 = vector.broadcast %cst_32 : f32 to vector<2x1xf32>
      %c0_33 = arith.constant 0 : index
      %c0_34 = arith.constant 0 : index
      %50 = vector.load %arg8[%c0_33, %c0_34] : memref<2x1xf32, #tpu.memory_space<vmem>>, vector<2x1xf32>
      tpu.vector_store %arg8[%c0_33, %c0_34], %49 {strides = array<i32>} : memref<2x1xf32, #tpu.memory_space<vmem>>, vector<2x1xf32>,
      %cst_35 = arith.constant 0.000000e+00 : f32
      %51 = vector.broadcast %cst_35 : f32 to vector<2x32xf32>
      %c0_36 = arith.constant 0 : index
      %c0_37 = arith.constant 0 : index
      %52 = vector.load %arg9[%c0_36, %c0_37] : memref<2x32xf32, #tpu.memory_space<vmem>>, vector<2x32xf32>
      tpu.vector_store %arg9[%c0_36, %c0_37], %51 {strides = array<i32>} : memref<2x32xf32, #tpu.memory_space<vmem>>, vector<2x32xf32>,
    } else {
    }
    %c0 = arith.constant 0 : index
    %c0_1 = arith.constant 0 : index
    %c0_2 = arith.constant 0 : index
    %3 = vector.load %arg3[%c0, %c0_1, %c0_2] : memref<2x8x32xf32, #tpu.memory_space<vmem>>, vector<2x8x32xf32>
    %c0_3 = arith.constant 0 : index
    %c0_4 = arith.constant 0 : index
    %4 = vector.load %arg4[%c0_3, %c0_4] : memref<2x8xf32, #tpu.memory_space<vmem>>, vector<2x8xf32>
    %cst = arith.constant 0.000000e+00 : f32
    %5 = vector.broadcast %cst : f32 to vector<2x8xf32>
    %6 = arith.cmpf one, %4, %5 : vector<2x8xf32>
    %c0_5 = arith.constant 0 : index
    %c0_6 = arith.constant 0 : index
    %7 = vector.load %arg2[%c0_5, %c0_6] : memref<2x32xf32, #tpu.memory_space<vmem>>, vector<2x32xf32>
    %8 = vector.shape_cast %7 : vector<2x32xf32> to vector<2x1x32xf32>
    %9 = vector.broadcast %8 : vector<2x1x32xf32> to vector<2x8x32xf32>
    %10 = arith.mulf %9, %3 : vector<2x8x32xf32>
    %cst_7 = arith.constant dense<0.000000e+00> : vector<2x8xf32>
    %11 = vector.multi_reduction <add>, %10, %cst_7 [2] : vector<2x8x32xf32> to vector<2x8xf32>
    %cst_8 = arith.constant -1.000000e+09 : f32
    %12 = vector.broadcast %cst_8 : f32 to vector<2x8xf32>
    %13 = arith.select %6, %11, %12 : vector<2x8xi1>, vector<2x8xf32>
    %14 = vector.shape_cast %3 : vector<2x8x32xf32> to vector<16x32xf32>
    %15 = arith.truncf %14 : vector<16x32xf32> to vector<16x32xbf16>
    %c0_9 = arith.constant 0 : index
    %c0_10 = arith.constant 0 : index
    %16 = vector.load %arg5[%c0_9, %c0_10] : memref<32x32xbf16, #tpu.memory_space<vmem>>, vector<32x32xbf16>
    %cst_11 = arith.constant dense<0.000000e+00> : vector<16x32xf32>
    %17 = tpu.matmul %15, %16, %cst_11 {dimension_numbers = #tpu.dot_dimension_numbers<[1], [0], [0], [1], [0, 0, 1, 1], [], []>} : vector<16x32xbf16>, vector<32x32xbf16>, vector<16x32xf32> -> vector<16x32xf32>
    %18 = vector.shape_cast %17 : vector<16x32xf32> to vector<2x8x32xf32>
    %c0_12 = arith.constant 0 : index
    %c0_13 = arith.constant 0 : index
    %19 = vector.load %arg7[%c0_12, %c0_13] : memref<2x1xf32, #tpu.memory_space<vmem>>, vector<2x1xf32>
    %cst_14 = arith.constant dense<0xFF800000> : vector<2xf32>
    %20 = vector.multi_reduction <maximumf>, %13, %cst_14 [1] : vector<2x8xf32> to vector<2xf32>
    %21 = vector.shape_cast %20 : vector<2xf32> to vector<2x1xf32>
    %22 = arith.maximumf %19, %21 : vector<2x1xf32>
    %23 = arith.subf %19, %22 : vector<2x1xf32>
    %24 = math.exp %23 : vector<2x1xf32>
    %25 = vector.broadcast %22 : vector<2x1xf32> to vector<2x8xf32>
    %26 = arith.subf %13, %25 : vector<2x8xf32>
    %27 = math.exp %26 : vector<2x8xf32>
    %c0_15 = arith.constant 0 : index
    %c0_16 = arith.constant 0 : index
    %28 = vector.load %arg8[%c0_15, %c0_16] : memref<2x1xf32, #tpu.memory_space<vmem>>, vector<2x1xf32>
    %29 = arith.mulf %24, %28 : vector<2x1xf32>
    %cst_17 = arith.constant dense<0.000000e+00> : vector<2xf32>
    %30 = vector.multi_reduction <add>, %27, %cst_17 [1] : vector<2x8xf32> to vector<2xf32>
    %31 = vector.shape_cast %30 : vector<2xf32> to vector<2x1xf32>
    %32 = arith.addf %29, %31 : vector<2x1xf32>
    %c0_18 = arith.constant 0 : index
    %c0_19 = arith.constant 0 : index
    %33 = vector.load %arg8[%c0_18, %c0_19] : memref<2x1xf32, #tpu.memory_space<vmem>>, vector<2x1xf32>
    tpu.vector_store %arg8[%c0_18, %c0_19], %32 {strides = array<i32>} : memref<2x1xf32, #tpu.memory_space<vmem>>, vector<2x1xf32>,
    %c0_20 = arith.constant 0 : index
    %c0_21 = arith.constant 0 : index
    %34 = vector.load %arg9[%c0_20, %c0_21] : memref<2x32xf32, #tpu.memory_space<vmem>>, vector<2x32xf32>
    %35 = vector.broadcast %24 : vector<2x1xf32> to vector<2x32xf32>
    %36 = arith.mulf %35, %34 : vector<2x32xf32>
    %37 = vector.shape_cast %27 : vector<2x8xf32> to vector<2x8x1xf32>
    %38 = vector.broadcast %37 : vector<2x8x1xf32> to vector<2x8x32xf32>
    %39 = arith.mulf %38, %18 : vector<2x8x32xf32>
    %cst_22 = arith.constant dense<0.000000e+00> : vector<2x32xf32>
    %40 = vector.multi_reduction <add>, %39, %cst_22 [1] : vector<2x8x32xf32> to vector<2x32xf32>
    %41 = arith.addf %36, %40 : vector<2x32xf32>
    %c0_23 = arith.constant 0 : index
    %c0_24 = arith.constant 0 : index
    %42 = vector.load %arg9[%c0_23, %c0_24] : memref<2x32xf32, #tpu.memory_space<vmem>>, vector<2x32xf32>
    tpu.vector_store %arg9[%c0_23, %c0_24], %41 {strides = array<i32>} : memref<2x32xf32, #tpu.memory_space<vmem>>, vector<2x32xf32>,
    %c0_25 = arith.constant 0 : index
    %c0_26 = arith.constant 0 : index
    %43 = vector.load %arg7[%c0_25, %c0_26] : memref<2x1xf32, #tpu.memory_space<vmem>>, vector<2x1xf32>
    tpu.vector_store %arg7[%c0_25, %c0_26], %22 {strides = array<i32>} : memref<2x1xf32, #tpu.memory_space<vmem>>, vector<2x1xf32>,
    %c0_i32_27 = arith.constant 0 : i32
    %44 = arith.cmpi eq, %arg1, %c0_i32_27 : i32
    %45 = arith.extui %44 : i1 to i32
    %c0_i32_28 = arith.constant 0 : i32
    %46 = arith.cmpi ne, %45, %c0_i32_28 : i32
    scf.if %46 {
      %c0_29 = arith.constant 0 : index
      %c0_30 = arith.constant 0 : index
      %47 = vector.load %arg8[%c0_29, %c0_30] : memref<2x1xf32, #tpu.memory_space<vmem>>, vector<2x1xf32>
      %48 = tpu.reciprocal %47 {approx = true} : vector<2x1xf32> -> vector<2x1xf32>
      %c0_31 = arith.constant 0 : index
      %c0_32 = arith.constant 0 : index
      %49 = vector.load %arg9[%c0_31, %c0_32] : memref<2x32xf32, #tpu.memory_space<vmem>>, vector<2x32xf32>
      %50 = vector.broadcast %48 : vector<2x1xf32> to vector<2x32xf32>
      %51 = arith.mulf %49, %50 : vector<2x32xf32>
      %c0_33 = arith.constant 0 : index
      %c0_34 = arith.constant 0 : index
      %52 = vector.load %arg6[%c0_33, %c0_34] : memref<2x32xf32, #tpu.memory_space<vmem>>, vector<2x32xf32>
      tpu.vector_store %arg6[%c0_33, %c0_34], %51 {strides = array<i32>} : memref<2x32xf32, #tpu.memory_space<vmem>>, vector<2x32xf32>,
    } else {
    }
    return
  }
  func.func @transform_0(%arg0: i32, %arg1: i32) -> (i32, i32) {
    %c0_i32 = arith.constant 0 : i32
    %c0_i32_0 = arith.constant 0 : i32
    return %arg0, %c0_i32 : i32, i32
  }
  func.func @transform_1(%arg0: i32, %arg1: i32) -> (i32, i32, i32) {
    %c0_i32 = arith.constant 0 : i32
    %c0_i32_0 = arith.constant 0 : i32
    return %arg0, %arg1, %c0_i32 : i32, i32, i32
  }
  func.func @transform_2(%arg0: i32, %arg1: i32) -> (i32, i32) {
    %c0_i32 = arith.constant 0 : i32
    return %arg0, %arg1 : i32, i32
  }
  func.func @transform_3(%arg0: i32, %arg1: i32) -> (i32, i32) {
    %c0_i32 = arith.constant 0 : i32
    %c0_i32_0 = arith.constant 0 : i32
    %c0_i32_1 = arith.constant 0 : i32
    return %c0_i32, %c0_i32_0 : i32, i32
  }
  func.func @transform_4(%arg0: i32, %arg1: i32) -> (i32, i32) {
    %c0_i32 = arith.constant 0 : i32
    %c0_i32_0 = arith.constant 0 : i32
    return %arg0, %c0_i32 : i32, i32
  }
}

</mosaic_0001>

<bundles_post_ra>
// kernel: tpu_custom_call.1
= control target key start
LH: loop header
LB: loop body
LE: loop exit
PB: predicated region body
PF: predicated region fallthrough
CT: control target
= control target key end

     0   :  { %9 = vsyncpa [#allocation6], 0  ;;  %s538_s0 = inlined_call_operand.hbm [shape: f32[2,32], index: 0, kind: input, shape index: {}]   ;;  %s539_s1 = inlined_call_operand.hbm [shape: f32[2,8,32], index: 1, kind: input, shape index: {}]   ;;  %s540_s2 = inlined_call_operand.vmem [shape: f32[2,8], index: 2, kind: input, shape index: {}]   ;;  %s541_s3 = inlined_call_operand.hbm [shape: bf16[32,32], index: 3, kind: input, shape index: {}]   ;;  %s542_s4 = inlined_call_operand.hbm [shape: f32[2,32], index: 4, kind: output, shape index: {}]  }
   0x1   :  { %10 = vsyncpa [#allocation9], 0 }
   0x2   :  { %11 = vsyncpa [#allocation7], 0  ;;  %s422_s15 = smov [#allocation8]   ;;  %s328_s19 = scalar_lea.hbm %s539_s1, 256 }
   0x3   :  { %s27_s16 = sshll.u32 %s422_s15, 4  ;;  %p329_p0 = scmp.ne.s32.totalorder %s539_s1, %s328_s19  ;;  %s28_s16 = int_to_ptr.vmem [resolvable:$true] %s27_s16 }
   0x4   :  { %p332_p1 = scmp.lt.u32.totalorder %s328_s19, %s539_s1 }
   0x6   :  { %p334_p2 = pnand %p332_p1, %p329_p0 }
   0x8   :  { %337 = shalt.err (!%p334_p2)
}
   0x9   :  { %s338_s24 = scalar_lea.vmem %s28_s16, 256  ;;  %p343_p4 = scmp.lt.s32.totalorder %s28_s16, %s28_s16 }
   0xa   :  { %p339_p3 = scmp.ne.s32.totalorder %s28_s16, %s338_s24  ;;  %p344_p5 = scmp.lt.s32.totalorder %s338_s24, %s338_s24 }
   0xc   :  { %p345_p6 = por %p344_p5, %p343_p4 }
   0xe   :  { %p346_p7 = pnand %p345_p6, %p339_p3 }
  0x10   :  { %349 = shalt.err (!%p346_p7)
}
  0x11   :  { %s423_s25 = smov 128   ;;  %s424_s26 = smov 8  }
  0x12   :  { %33 = dma.hbm_to_vmem [thread:$0]  %s539_s1, 256, %s28_s16, [#allocation9], %s423_s25, %s423_s25, %s424_s26  }
  0x13   :  { %s425_s29 = smov [#allocation5]   ;;  %s426_s5 = smov [#allocation10]  }
  0x14   :  { %s18_s30 = sshll.u32 %s425_s29, 4  ;;  %s41_s6 = sshll.u32 %s426_s5, 4  ;;  %s19_s30 = int_to_ptr.vmem [resolvable:$true] %s18_s30  ;;  %s42_s6 = int_to_ptr.vmem [resolvable:$true] %s41_s6 }
  0x15   :  { %s350_s9 = scalar_lea.hbm %s538_s0, 32 }
  0x16   :  { %p351_p8 = scmp.ne.s32.totalorder %s538_s0, %s350_s9  ;;  %p354_p9 = scmp.lt.u32.totalorder %s350_s9, %s538_s0 }
  0x18   :  { %p356_p10 = pnand %p354_p9, %p351_p8 }
  0x1a   :  { %359 = shalt.err (!%p356_p10)
}
  0x1b   :  { %s360_s1 = scalar_lea.vmem %s19_s30, 32  ;;  %p365_p12 = scmp.lt.s32.totalorder %s19_s30, %s19_s30 }
  0x1c   :  { %p361_p11 = scmp.ne.s32.totalorder %s19_s30, %s360_s1  ;;  %p366_p13 = scmp.lt.s32.totalorder %s360_s1, %s360_s1 }
  0x1e   :  { %p367_p0 = por %p366_p13, %p365_p12 }
  0x20   :  { %p368_p1 = pnand %p367_p0, %p361_p11 }
  0x22   :  { %371 = shalt.err (!%p368_p1)
}
  0x23   :  { %21 = dma.hbm_to_vmem [thread:$0]  %s538_s0, 32, %s19_s30, [#allocation6]  }
  0x24   :  { %s372_s18 = scalar_lea.hbm %s541_s3, 256 }
  0x25   :  { %p373_p2 = scmp.ne.s32.totalorder %s541_s3, %s372_s18  ;;  %p376_p3 = scmp.lt.u32.totalorder %s372_s18, %s541_s3 }
  0x27   :  { %p378_p4 = pnand %p376_p3, %p373_p2 }
  0x29   :  { %381 = shalt.err (!%p378_p4)
}
  0x2a   :  { %s382_s23 = scalar_lea.vmem %s42_s6, 256  ;;  %p387_p6 = scmp.lt.s32.totalorder %s42_s6, %s42_s6 }
  0x2b   :  { %p383_p5 = scmp.ne.s32.totalorder %s42_s6, %s382_s23  ;;  %p388_p7 = scmp.lt.s32.totalorder %s382_s23, %s382_s23 }
  0x2d   :  { %p389_p8 = por %p388_p7, %p387_p6 }
  0x2f   :  { %p390_p9 = pnand %p389_p8, %p383_p5 }
  0x31   :  { %393 = shalt.err (!%p390_p9)
}
  0x32   :  { %s427_s0 = smov 64   ;;  %s428_s24 = smov 4  }
  0x33   :  { %47 = dma.hbm_to_vmem [thread:$0]  %s541_s3, 256, %s42_s6, [#allocation9], %s427_s0, %s427_s0, %s428_s24  }
  0x34   :  { %416 = dma.done.wait [#allocation6], 32  }
  0x35   :  { %417 = vsyncadd [#allocation6], 4294967264 }
  0x36   :  { %418 = dma.done.wait [#allocation9], 512  }
  0x37   :  { %419 = vsyncadd [#allocation9], 4294966784  ;;  %v84_v0 = vlaneseq  ;;  %v429_v1 = vmov 1966171168   ;;  %v67_v7 = vld [vmem:[#allocation8] sm:$0xff]  ;;  %v68_v9 = vld [vmem:[#allocation8 + $0x8] sm:$0xff] }
  0x38   :  { %v82_v2 = vunpack.c.l.s4 %v429_v1  ;;  %v290_v8 = vld.sshfl [vmem:[#allocation5] sm:$0x11 pattern:$0x75316420]  ;;  %v130_v12 = vpack.c.bf16 %v68_v9, %v67_v7  ;;  %vm107_vm0 = vcmask 261120   ;;  %vm62_vm1 = vcmask 1024  }
  0x39   :  { %v496_v3 = vshrl.u32 %v84_v0, 7  ;;  %v80_v10 = vcombine.high %v290_v8, %v290_v8  ;;  %v430_v20 = vmov -inf   ;;  %v117_v21 = vand.u32 127, %v84_v0  ;;  %v69_v24 = vld [vmem:[%s540_s2] sm:$0x3]  ;;  %v320_v32 = vld [vmem:[#allocation10] sm:$0xff]  }
  0x3a   :  { %v83_v4 = vunpack.c.0.s8 %v82_v2  ;;  %63 = vst.msk [vmem:[#allocation2] sm:$0x3] %vm62_vm1, %v430_v20  ;;  %vm126_vm2 = vcmask 1041409   ;;  %vm70_vm3 = vcmp.ne.f32.partialorder %v69_v24, 0.0  ;;  %vm192_vm4 = vcmask 58368   ;;  %v321_v34 = vld [vmem:[#allocation10 + $0x8] sm:$0xff]  }
  0x3b   :  { %v500_v6 = vsub.s32 0, %v496_v3  ;;  %v120_v23 = vsub.s32 %v117_v21, %v496_v3  ;;  %v431_v31 = vmov 0   ;;  %v432_v33 = vmov 0.0   ;;  %s434_s2 = smov [#allocation11]  }
  0x3c   :  { %v86_v5 = vsub.s32 %v83_v4, %v496_v3  ;;  %318 = vset.pattern.permute.xlu1 %v431_v31  ;;  %319 = vset.pattern.permute.xlu0 %v431_v31  ;;  %64 = vst.msk [vmem:[#allocation3] sm:$0x3] %vm62_vm1, %v432_v33  ;;  %vm433_vm5 = vmmov 0   ;;  %v232_v47 = vsub.s32 1, %v496_v3  ;;  %vm65_vm6 = vcmask 254976   ;;  %s280_s28 = sshll.u32 %s434_s2, 4  ;;  %s281_s28 = int_to_ptr.vmem [resolvable:$true] %s280_s28 }
  0x3d   :  { %297 = vmatprep.subr.bf16.mxu0 %v432_v33  ;;  %301 = vmatprep.mubr.msk.bf16.mxu0 %vm433_vm5, %v432_v33  ;;  %66 = vst.msk [vmem:[#allocation4] sm:$0x3] %vm65_vm6, %v432_v33  ;;  %s394_s29 = scalar_lea.vmem %s281_s28, 32  ;;  %p399_p11 = scmp.lt.s32.totalorder %s281_s28, %s281_s28 }
  0x3e   :  { %v87_v11 = vrot.slane %v290_v8, %v86_v5  ;;  %v94_v14 = vrot.slane %v80_v10, %v86_v5  ;;  %298 = vmatpush3.bf16.msra.mxu0 %v320_v32  ;;  %p395_p10 = scmp.ne.s32.totalorder %s281_s28, %s394_s29  ;;  %p400_p12 = scmp.lt.s32.totalorder %s394_s29, %s394_s29 }
  0x3f   :  { %299 = vmatprep.subr.bf16.mxu0 %v432_v33 }
  0x40   :  { %v98_v13 = vrot.slane %v87_v11, %v500_v6  ;;  %v102_v16 = vrot.slane %v94_v14, %v500_v6  ;;  %p401_p13 = por %p400_p12, %p399_p11 }
  0x41   :  { %v191_v35 = vld [vmem:[#allocation2] sm:$0x3] }
  0x42   :  { %v105_v15 = vmul.f32 %v98_v13, %v67_v7  ;;  %v106_v18 = vmul.f32 %v102_v16, %v68_v9  ;;  %300 = vmatpush3.bf16.msra.mxu0 %v321_v34  ;;  %p402_p0 = pnand %p401_p13, %p395_p10 }
  0x43   :  { %v208_v56 = vld [vmem:[#allocation3] sm:$0x3] }
  0x44   :  { %v108_v17 = vsel %vm107_vm0, %v105_v15, 0.0  ;;  %v111_v19 = vsel %vm107_vm0, %v106_v18, 0.0  ;;  %v216_v9 = vld [vmem:[#allocation4] sm:$0x3] }
  0x45   :  { %109 = vadd.xlane.f32.xlu0 %v108_v17  ;;  %302 = vmatmul.mubr.msk.bf16.vlgmr.msra.gmra.mrb[0].mxu0 %vm107_vm0, %v130_v12 }
  0x49   :  { %112 = vadd.xlane.f32.xlu0 %v111_v19 }
  0xd2   :  { %v110_v22 = vpop.xlane.xlu0 %109 }
  0xd3   :  { %v121_v26 = vrot.slane %v110_v22, %v120_v23 }
  0xd6   :  { %v113_v25 = vpop.xlane.xlu0 %112 }
  0xd7   :  { %v125_v27 = vrot.slane %v113_v25, %v120_v23 }
  0xd9   :  { %v127_v28 = vsel %vm126_vm2, %v125_v27, %v121_v26 }
  0xda   :  { %v129_v29 = vsel %vm70_vm3, %v127_v28, -1e+09 }
  0xdb   :  { %v193_v30 = vsel %vm192_vm4, %v129_v29, -inf }
  0xdc   :  { %194 = vmax.xlane.f32.xlu1 %v193_v30 }
 0x118   :  { %v184_v39 = vpop.f32.mrb[0].mxu0 }
 0x119   :  { %v303_v40 = vpop.f32.mrb[1].mxu0 }
 0x11a   :  { %v187_v41 = vpop.f32.mrb[2].mxu0 }
 0x11b   :  { %v304_v42 = vpop.f32.mrb[3].mxu0 }
 0x169   :  { %v195_v36 = vpop.xlane.xlu1 %194 }
 0x16a   :  { %v196_v37 = vmax.f32 %v191_v35, %v195_v36 }
 0x16c   :  { %v197_v38 = vsub.f32 %v191_v35, %v196_v37  ;;  %260 = vst.msk [vmem:[#allocation2] sm:$0x3] %vm62_vm1, %v196_v37  ;;  %202 = vperm.xlu1 %318, %v196_v37  }
 0x16e   :  { %v198_v46 = vmul.f32 1.442695, %v197_v38 }
 0x1eb   :  { %v203_v43 = vpop.permute.xlu1 %202 }
 0x1ec   :  { %v205_v44 = vsub.f32 %v129_v29, %v203_v43 }
 0x1ee   :  { %v206_v45 = vmul.f32 1.442695, %v205_v44 }
 0x1f0   :  { %322 = vpow2.f32 %v206_v45 }
 0x1f1   :  { %324 = vpow2.f32 %v198_v46 }
 0x1fa   :  { %v323_v48 = vpop.eup %322 }
 0x1fb   :  { %v210_v49 = vsel %vm192_vm4, %v323_v48, 0.0  ;;  %v233_v50 = vrot.slane %v323_v48, %v232_v47  ;;  %v325_v51 = vpop.eup %324  ;;  %v226_v52 = vrot.slane %v323_v48, %v500_v6 }
 0x1fc   :  { %211 = vadd.xlane.f32.xlu0 %v210_v49  ;;  %v209_v58 = vmul.f32 %v325_v51, %v208_v56 }
 0x1fd   :  { %235 = vbcast.lane.b32.xlu1 %v233_v50, 256 }
 0x201   :  { %219 = vperm.xlu1 %318, %v325_v51  }
 0x212   :  { %228 = vbcast.lane.b32.xlu0 %v226_v52, 256 }
 0x26f   :  { %v236_v53 = vpop.permute.xlu1 %235 }
 0x270   :  { %v238_v54 = vmul.f32 %v236_v53, %v187_v41 }
 0x272   :  { %v246_v55 = vsel %vm107_vm0, %v238_v54, 0.0 }
 0x273   :  { %v247_v57 = vrot.slane %v246_v55, 4 }
 0x275   :  { %v248_v61 = vadd.f32 %v247_v57, %v246_v55 }
 0x277   :  { %v249_v0 = vrot.slane %v248_v61, 2 }
 0x279   :  { %v250_v3 = vadd.f32 %v249_v0, %v248_v61 }
 0x27b   :  { %v251_v7 = vrot.slane %v250_v3, 1 }
 0x27d   :  { %v252_v12 = vadd.f32 %v251_v7, %v250_v3 }
 0x280   :  { %v220_v10 = vpop.permute.xlu1 %219 }
 0x281   :  { %v222_v14 = vmul.f32 %v220_v10, %v216_v9 }
 0x289   :  { %v212_v59 = vpop.xlane.xlu0 %211 }
 0x28a   :  { %v213_v60 = vadd.f32 %v212_v59, %v209_v58 }
 0x28c   :  { %215 = vst.msk [vmem:[#allocation3] sm:$0x3] %vm62_vm1, %v213_v60 }
 0x28d   :  { %v229_v62 = vpop.permute.xlu0 %228 }
 0x28e   :  { %v237_v63 = vmul.f32 %v229_v62, %v184_v39 }
 0x290   :  { %v239_v1 = vsel %vm107_vm0, %v237_v63, 0.0 }
 0x291   :  { %v240_v2 = vrot.slane %v239_v1, 4 }
 0x293   :  { %v241_v4 = vadd.f32 %v240_v2, %v239_v1  ;;  %v264_v5 = vld [vmem:[#allocation3] sm:$0x3] }
 0x294   :  { %326 = vrcp.f32 %v264_v5 }
 0x295   :  { %v242_v6 = vrot.slane %v241_v4, 2 }
 0x297   :  { %v243_v8 = vadd.f32 %v242_v6, %v241_v4 }
 0x299   :  { %v244_v11 = vrot.slane %v243_v8, 1 }
 0x29b   :  { %v245_v13 = vadd.f32 %v244_v11, %v243_v8 }
 0x29d   :  { %v255_v15 = vsel %vm126_vm2, %v252_v12, %v245_v13 }
 0x29e   :  { %v327_v16 = vpop.eup %326  ;;  %v257_v17 = vadd.f32 %v255_v15, %v222_v14 }
 0x29f   :  { %269 = vperm.xlu1 %318, %v327_v16  }
 0x2a0   :  { %259 = vst.msk [vmem:[#allocation4] sm:$0x3] %vm65_vm6, %v257_v17 }
 0x2a7   :  { %v266_v18 = vld [vmem:[#allocation4] sm:$0x3] }
 0x31e   :  { %v270_v19 = vpop.permute.xlu1 %269 }
 0x31f   :  { %v272_v20 = vmul.f32 %v270_v19, %v266_v18 }
 0x321   :  { %273 = vst.msk [vmem:[#allocation11] sm:$0x3] %vm65_vm6, %v272_v20 }
 0x322   :  { %405 = shalt.err (!%p402_p0)
}
 0x323   :  { %s406_s6 = scalar_lea.hbm %s542_s4, 32 }
 0x324   :  { %p407_p1 = scmp.ne.s32.totalorder %s542_s4, %s406_s6  ;;  %p410_p2 = scmp.lt.u32.totalorder %s406_s6, %s542_s4 }
 0x326   :  { %p412_p3 = pnand %p410_p2, %p407_p1 }
 0x328   :  { %415 = shalt.err (!%p412_p3)
}
 0x329   :  { %283 = dma.vmem_to_hbm [thread:$0]  %s281_s28, 32, %s542_s4, [#allocation7]  }
 0x32a   :  { %420 = dma.done.wait [#allocation7], 32  }
 0x32b   :  { %421 = vsyncadd [#allocation7], 4294967264 }
 0x32c   :  { %287 = vsyncpa [#allocation6], 1 }
 0x32d   :  { %288 = vsyncpa [#allocation9], 1 }
 0x32e   :  { %289 = vsyncpa [#allocation7], 1 }

</bundles_post_ra>
